<compile_context>
chip_gen: v5e
topology: v5e:2x2
jax: 0.10.0
libtpu: 0.0.40
codegen_flags: <defaults>
</compile_context>

<pallas_src>
import functools

import jax
import jax.numpy as jnp
from jax.experimental import pallas as pl
from jax.experimental.pallas import tpu as pltpu

INPUT_SIZE = 70
HIDDEN1 = 32
HIDDEN2 = 32
HIDDEN3 = 16
HIDDEN4 = 16
LATENT = 16
BN_EPS = 1e-5

FPAD = 128          # lane-dense padded feature width
N_BN = 8
N_LINEAR = 10

# Whole-batch single tile (training-mode BatchNorm needs full-batch stats).
# ~10 live (B,128) f32-equivalent buffers + ~0.4 MiB of weights must fit the
# scoped VMEM budget; B=8192 is ~45 MiB, safe on v5e/v6e (128 MiB VMEM) and
# within v7x's 64 MiB with headroom.
MAX_BATCH = 8192

# (fan_in, fan_out, feeds_batchnorm) for the 10 Linear layers in forward order.
LAYER_DIMS = (
    (INPUT_SIZE, HIDDEN1, True),    # encoder.input_to_hidden1   -> Batch1
    (HIDDEN1, HIDDEN2, True),       # encoder.hidden1_to_hidden2 -> Batch2
    (HIDDEN2, HIDDEN3, True),       # encoder.hidden2_to_hidden3 -> Batch3
    (HIDDEN3, HIDDEN4, True),       # encoder.hidden3_to_hidden4 -> Batch4
    (HIDDEN4, LATENT, False),       # encoder.hidden4_to_mean    (bias kept)
    (LATENT, HIDDEN4, True),        # decoder.latent_to_hidden4  -> Batch4
    (HIDDEN4, HIDDEN3, True),       # decoder.hidden4_to_hidden3 -> Batch3
    (HIDDEN3, HIDDEN2, True),       # decoder.hidden3_to_hidden2 -> Batch2
    (HIDDEN2, HIDDEN1, True),       # decoder.hidden2_to_hidden1 -> Batch1
    (HIDDEN1, INPUT_SIZE, False),   # decoder.hidden1_to_output  (bias kept)
)


# ----------------------------------------------------------------------------
# Kernel
# ----------------------------------------------------------------------------
def ae_kernel(x_ref, w_ref, v_ref, recon_ref, latent_ref,
              xpad_ref, latbuf_ref, lat_sem, *, inv_b):
    def linear(h, i):
        # bf16 x bf16 -> f32 accumulation: single-pass (B,128)@(128,128) MXU op.
        return jnp.dot(h.astype(jnp.bfloat16), w_ref[i],
                       preferred_element_type=jnp.float32)

    def bn_relu(y, bn_idx):
        # Training-mode BatchNorm1d over the batch (sublane) axis, two-pass
        # variance (matches PyTorch, avoids E[y^2]-mu^2 cancellation), fused
        # affine.  Padded lanes stay exactly zero because gamma/beta pad = 0.
        mu = jnp.sum(y, axis=0, keepdims=True) * inv_b
        d = y - mu
        var = jnp.sum(d * d, axis=0, keepdims=True) * inv_b
        s = v_ref[bn_idx:bn_idx + 1, :] * jax.lax.rsqrt(var + BN_EPS)
        return jnp.maximum(d * s + v_ref[N_BN + bn_idx:N_BN + bn_idx + 1, :], 0.0)

    # Pad x (B, 70) -> (B, 128) inside VMEM so every matmul is a fully aligned,
    # lane-dense (B,128)@(128,128).  Removes the wrapper-side jnp.pad HBM pass.
    xpad_ref[...] = jnp.zeros_like(xpad_ref)
    xpad_ref[:, :INPUT_SIZE] = x_ref[...]
    h = xpad_ref[...]

    # ----- Encoder: 4 x (Linear -> BN -> ReLU); biases cancelled by BN -------
    for l in range(4):
        h = bn_relu(linear(h, l), l)

    # hidden4 -> mean (latent); bias kept.
    latent = linear(h, 4) + v_ref[2 * N_BN:2 * N_BN + 1, :]

    # Start the latent writeback now and hide it behind the decoder.
    latbuf_ref[...] = latent[:, :LATENT]
    lat_copy = pltpu.make_async_copy(latbuf_ref, latent_ref, lat_sem)
    lat_copy.start()

    # ----- Decoder: 4 x (Linear -> BN -> ReLU) -------------------------------
    h = latent
    for l in range(4):
        h = bn_relu(linear(h, 5 + l), 4 + l)

    # hidden1 -> output; bias kept.  Exact-shaped (B, 70) store.
    recon = linear(h, 9) + v_ref[2 * N_BN + 1:2 * N_BN + 2, :]
    recon_ref[...] = recon[:, :INPUT_SIZE]

    lat_copy.wait()


# ----------------------------------------------------------------------------
# Wrapper
# ----------------------------------------------------------------------------
def _vmem_limit_bytes(batch):
    weights = N_LINEAR * FPAD * FPAD * 2 + (2 * N_BN + 2) * FPAD * 4
    # Generous bound: ~10 simultaneously-live (B,128)-wide f32 buffers
    # (x, padded x, recon, latent scratch, activations, BN temporaries).
    per_row = 10 * FPAD * 4
    budget = weights + batch * per_row + (4 << 20)
    return int(min(max(budget, 8 << 20), 48 << 20))   # safe on 64 MiB v7x


@jax.jit
def autoencoder_forward(x, w_blob, v_blob):
    B = x.shape[0]
    if B > MAX_BATCH:
        raise ValueError(
            f"batch {B} > {MAX_BATCH}: training-mode BatchNorm needs whole-batch"
            " statistics in one VMEM tile (see TODO(synk) for the gridded path).")
    x = x.astype(jnp.float32)

    vmem = pl.BlockSpec(memory_space=pltpu.MemorySpace.VMEM)
    flops = 2 * B * FPAD * FPAD * N_LINEAR
    bytes_accessed = (B * INPUT_SIZE * 4 * 2 + B * LATENT * 4
                      + N_LINEAR * FPAD * FPAD * 2 + (2 * N_BN + 2) * FPAD * 4)

    recon, latent = pl.pallas_call(
        functools.partial(ae_kernel, inv_b=1.0 / B),
        out_shape=(jax.ShapeDtypeStruct((B, INPUT_SIZE), jnp.float32),
                   jax.ShapeDtypeStruct((B, LATENT), jnp.float32)),
        in_specs=[vmem, vmem, vmem],
        out_specs=(vmem,                                   # recon: auto DMA
                   pl.BlockSpec(memory_space=pl.ANY)),     # latent: manual DMA
        scratch_shapes=[pltpu.VMEM((B, FPAD), jnp.float32),
                        pltpu.VMEM((B, LATENT), jnp.float32),
                        pltpu.SemaphoreType.DMA(())],
        compiler_params=pltpu.CompilerParams(
            vmem_limit_bytes=_vmem_limit_bytes(B)),
        cost_estimate=pl.CostEstimate(flops=flops,
                                      transcendentals=N_BN * FPAD,
                                      bytes_accessed=bytes_accessed),
    )(x, w_blob, v_blob)
    return recon, latent


# ----------------------------------------------------------------------------
# Deterministic parameter construction and packing
# ----------------------------------------------------------------------------
def make_params(seed=0):
    """Logical params: 10 (w(in,out), b(out,)) Linears + 8 (gamma, beta) BNs."""
    key = jax.random.PRNGKey(seed)
    keys = jax.random.split(key, len(LAYER_DIMS))
    linears = []
    for k, (din, dout, _) in zip(keys, LAYER_DIMS):
        kw, kb = jax.random.split(k)
        bound = float(din) ** -0.5
        w = jax.random.uniform(kw, (din, dout), jnp.float32, -bound, bound)
        b = jax.random.uniform(kb, (dout,), jnp.float32, -bound, bound)
        linears.append((w, b))
    bns = [(jnp.ones((dout,), jnp.float32), jnp.zeros((dout,), jnp.float32))
           for (_din, dout, has_bn) in LAYER_DIMS if has_bn]
    return linears, bns


def pack_params(linears, bns):
    """Pack 36 small tensors into 2 blobs: bf16 weight slabs + f32 vectors."""
    w_blob = jnp.zeros((N_LINEAR, FPAD, FPAD), jnp.float32)
    for i, (w, _b) in enumerate(linears):
        w_blob = w_blob.at[i, :w.shape[0], :w.shape[1]].set(w)
    w_blob = w_blob.astype(jnp.bfloat16)          # single-pass MXU inputs
    v_blob = jnp.zeros((2 * N_BN + 2, FPAD), jnp.float32)
    for j, (g, be) in enumerate(bns):
        v_blob = v_blob.at[j, :g.shape[0]].set(g)
        v_blob = v_blob.at[N_BN + j, :be.shape[0]].set(be)
    v_blob = v_blob.at[2 * N_BN, :LATENT].set(linears[4][1])       # mean bias
    v_blob = v_blob.at[2 * N_BN + 1, :INPUT_SIZE].set(linears[9][1])  # out bias
    return w_blob, v_blob


# ----------------------------------------------------------------------------
# Pure-JAX reference (PyTorch semantics: all biases, two-pass var, 1/sqrt).
# matmul_dtype=bfloat16 mirrors the kernel's MXU input precision exactly.
# ----------------------------------------------------------------------------
def reference_forward(x, linears, bns, matmul_dtype=jnp.float32):
    def mm(h, w):
        return jnp.dot(h.astype(matmul_dtype), w.astype(matmul_dtype),
                       preferred_element_type=jnp.float32)

    def bn_relu(y, g, be):
        mu = jnp.mean(y, axis=0, keepdims=True)
        var = jnp.mean((y - mu) ** 2, axis=0, keepdims=True)
        return jnp.maximum((y - mu) / jnp.sqrt(var + BN_EPS) * g + be, 0.0)

    h = x
    for l in range(4):
        w, b = linears[l]
        h = bn_relu(mm(h, w) + b, *bns[l])
    w, b = linears[4]
    latent = mm(h, w) + b
    h = latent
    for l in range(4):
        w, b = linears[5 + l]
        h = bn_relu(mm(h, w) + b, *bns[4 + l])
    w, b = linears[9]
    return mm(h, w) + b, latent


# ----------------------------------------------------------------------------
if __name__ == "__main__":
    batch = 8   # B is a multiple of 8 (sublane-aligned batch statistics)
    x = jax.random.normal(jax.random.PRNGKey(0), (batch, INPUT_SIZE), jnp.float32)

    linears, bns = make_params(seed=0)
    w_blob, v_blob = pack_params(linears, bns)

    x_recon, latent = autoencoder_forward(x, w_blob, v_blob)
    jax.block_until_ready((x_recon, latent))

    assert x_recon.shape == (batch, INPUT_SIZE) and x_recon.dtype == jnp.float32
    assert latent.shape == (batch, LATENT) and latent.dtype == jnp.float32

    # Tight check vs a reference that mirrors the kernel's bf16 MXU inputs
    # (same weight rounding / activation casts, full PyTorch op order).
    m_recon, m_latent = reference_forward(x, linears, bns,
                                          matmul_dtype=jnp.bfloat16)
    assert jnp.allclose(latent, m_latent, atol=3e-2, rtol=3e-2), \
        float(jnp.max(jnp.abs(latent - m_latent)))
    assert jnp.allclose(x_recon, m_recon, atol=3e-2, rtol=3e-2), \
        float(jnp.max(jnp.abs(x_recon - m_recon)))

    # Loose sanity check vs full-f32 PyTorch semantics: bounds the intentional
    # bf16 weight/activation quantization drift end-to-end.
    f_recon, f_latent = reference_forward(x, linears, bns,
                                          matmul_dtype=jnp.float32)
    assert jnp.allclose(latent, f_latent, atol=0.25, rtol=0.25), \
        float(jnp.max(jnp.abs(latent - f_latent)))
    assert jnp.allclose(x_recon, f_recon, atol=0.25, rtol=0.25), \
        float(jnp.max(jnp.abs(x_recon - f_recon)))

    print("KERNEL_OK")
</pallas_src>

<mosaic_0001>
module attributes {stable_mosaic.version = 11 : i64} {
  func.func @ae_kernel(%arg0: memref<8x70xf32, #tpu.memory_space<vmem>>, %arg1: memref<10x128x128xbf16, #tpu.memory_space<vmem>>, %arg2: memref<18x128xf32, #tpu.memory_space<vmem>>, %arg3: memref<8x70xf32, #tpu.memory_space<vmem>>, %arg4: memref<8x16xf32, #tpu.memory_space<any>>, %arg5: memref<8x128xf32, #tpu.memory_space<vmem>>, %arg6: memref<8x16xf32, #tpu.memory_space<vmem>>, %arg7: memref<!tpu.dma_semaphore, #tpu.memory_space<semaphore_mem>>) attributes {dimension_semantics = [], scalar_prefetch = 0 : i64, scratch_operands = 3 : i64, tpu.core_type = #tpu.core_type<tc>} {
    %cst = arith.constant 0.000000e+00 : f32
    %0 = vector.broadcast %cst : f32 to vector<8x128xf32>
    %c0 = arith.constant 0 : index
    %c0_0 = arith.constant 0 : index
    %1 = vector.load %arg5[%c0, %c0_0] : memref<8x128xf32, #tpu.memory_space<vmem>>, vector<8x128xf32>
    tpu.vector_store %arg5[%c0, %c0_0], %0 {strides = array<i32>} : memref<8x128xf32, #tpu.memory_space<vmem>>, vector<8x128xf32>,
    %c0_1 = arith.constant 0 : index
    %c0_2 = arith.constant 0 : index
    %2 = vector.load %arg0[%c0_1, %c0_2] : memref<8x70xf32, #tpu.memory_space<vmem>>, vector<8x70xf32>
    %c0_3 = arith.constant 0 : index
    %c0_4 = arith.constant 0 : index
    %3 = vector.load %arg5[%c0_3, %c0_4] : memref<8x128xf32, #tpu.memory_space<vmem>>, vector<8x70xf32>
    tpu.vector_store %arg5[%c0_3, %c0_4], %2 {strides = array<i32>} : memref<8x128xf32, #tpu.memory_space<vmem>>, vector<8x70xf32>,
    %c0_5 = arith.constant 0 : index
    %c0_6 = arith.constant 0 : index
    %4 = vector.load %arg5[%c0_5, %c0_6] : memref<8x128xf32, #tpu.memory_space<vmem>>, vector<8x128xf32>
    %5 = arith.truncf %4 : vector<8x128xf32> to vector<8x128xbf16>
    %c0_7 = arith.constant 0 : index
    %c0_8 = arith.constant 0 : index
    %c0_9 = arith.constant 0 : index
    %6 = vector.load %arg1[%c0_7, %c0_8, %c0_9] : memref<10x128x128xbf16, #tpu.memory_space<vmem>>, vector<1x128x128xbf16>
    %7 = vector.shape_cast %6 : vector<1x128x128xbf16> to vector<128x128xbf16>
    %cst_10 = arith.constant dense<0.000000e+00> : vector<8x128xf32>
    %8 = tpu.matmul %5, %7, %cst_10 {dimension_numbers = #tpu.dot_dimension_numbers<[1], [0], [0], [1], [0, 0, 1, 1], [], []>} : vector<8x128xbf16>, vector<128x128xbf16>, vector<8x128xf32> -> vector<8x128xf32>
    %cst_11 = arith.constant dense<0.000000e+00> : vector<128xf32>
    %9 = vector.multi_reduction <add>, %8, %cst_11 [0] : vector<8x128xf32> to vector<128xf32>
    %10 = vector.shape_cast %9 : vector<128xf32> to vector<1x128xf32>
    %cst_12 = arith.constant 1.250000e-01 : f32
    %11 = vector.broadcast %cst_12 : f32 to vector<1x128xf32>
    %12 = arith.mulf %10, %11 : vector<1x128xf32>
    %13 = vector.broadcast %12 : vector<1x128xf32> to vector<8x128xf32>
    %14 = arith.subf %8, %13 : vector<8x128xf32>
    %15 = arith.mulf %14, %14 : vector<8x128xf32>
    %cst_13 = arith.constant dense<0.000000e+00> : vector<128xf32>
    %16 = vector.multi_reduction <add>, %15, %cst_13 [0] : vector<8x128xf32> to vector<128xf32>
    %17 = vector.shape_cast %16 : vector<128xf32> to vector<1x128xf32>
    %cst_14 = arith.constant 1.250000e-01 : f32
    %18 = vector.broadcast %cst_14 : f32 to vector<1x128xf32>
    %19 = arith.mulf %17, %18 : vector<1x128xf32>
    %c0_15 = arith.constant 0 : index
    %c0_16 = arith.constant 0 : index
    %20 = vector.load %arg2[%c0_15, %c0_16] : memref<18x128xf32, #tpu.memory_space<vmem>>, vector<1x128xf32>
    %cst_17 = arith.constant 9.99999974E-6 : f32
    %21 = vector.broadcast %cst_17 : f32 to vector<1x128xf32>
    %22 = arith.addf %19, %21 : vector<1x128xf32>
    %23 = math.rsqrt %22 : vector<1x128xf32>
    %24 = arith.mulf %20, %23 : vector<1x128xf32>
    %25 = vector.broadcast %24 : vector<1x128xf32> to vector<8x128xf32>
    %26 = arith.mulf %14, %25 : vector<8x128xf32>
    %c8 = arith.constant 8 : index
    %c0_18 = arith.constant 0 : index
    %27 = vector.load %arg2[%c8, %c0_18] : memref<18x128xf32, #tpu.memory_space<vmem>>, vector<1x128xf32>
    %28 = vector.broadcast %27 : vector<1x128xf32> to vector<8x128xf32>
    %29 = arith.addf %26, %28 : vector<8x128xf32>
    %cst_19 = arith.constant 0.000000e+00 : f32
    %30 = vector.broadcast %cst_19 : f32 to vector<8x128xf32>
    %31 = arith.maximumf %29, %30 : vector<8x128xf32>
    %32 = arith.truncf %31 : vector<8x128xf32> to vector<8x128xbf16>
    %c1 = arith.constant 1 : index
    %c0_20 = arith.constant 0 : index
    %c0_21 = arith.constant 0 : index
    %33 = vector.load %arg1[%c1, %c0_20, %c0_21] : memref<10x128x128xbf16, #tpu.memory_space<vmem>>, vector<1x128x128xbf16>
    %34 = vector.shape_cast %33 : vector<1x128x128xbf16> to vector<128x128xbf16>
    %cst_22 = arith.constant dense<0.000000e+00> : vector<8x128xf32>
    %35 = tpu.matmul %32, %34, %cst_22 {dimension_numbers = #tpu.dot_dimension_numbers<[1], [0], [0], [1], [0, 0, 1, 1], [], []>} : vector<8x128xbf16>, vector<128x128xbf16>, vector<8x128xf32> -> vector<8x128xf32>
    %cst_23 = arith.constant dense<0.000000e+00> : vector<128xf32>
    %36 = vector.multi_reduction <add>, %35, %cst_23 [0] : vector<8x128xf32> to vector<128xf32>
    %37 = vector.shape_cast %36 : vector<128xf32> to vector<1x128xf32>
    %cst_24 = arith.constant 1.250000e-01 : f32
    %38 = vector.broadcast %cst_24 : f32 to vector<1x128xf32>
    %39 = arith.mulf %37, %38 : vector<1x128xf32>
    %40 = vector.broadcast %39 : vector<1x128xf32> to vector<8x128xf32>
    %41 = arith.subf %35, %40 : vector<8x128xf32>
    %42 = arith.mulf %41, %41 : vector<8x128xf32>
    %cst_25 = arith.constant dense<0.000000e+00> : vector<128xf32>
    %43 = vector.multi_reduction <add>, %42, %cst_25 [0] : vector<8x128xf32> to vector<128xf32>
    %44 = vector.shape_cast %43 : vector<128xf32> to vector<1x128xf32>
    %cst_26 = arith.constant 1.250000e-01 : f32
    %45 = vector.broadcast %cst_26 : f32 to vector<1x128xf32>
    %46 = arith.mulf %44, %45 : vector<1x128xf32>
    %c1_27 = arith.constant 1 : index
    %c0_28 = arith.constant 0 : index
    %47 = vector.load %arg2[%c1_27, %c0_28] : memref<18x128xf32, #tpu.memory_space<vmem>>, vector<1x128xf32>
    %cst_29 = arith.constant 9.99999974E-6 : f32
    %48 = vector.broadcast %cst_29 : f32 to vector<1x128xf32>
    %49 = arith.addf %46, %48 : vector<1x128xf32>
    %50 = math.rsqrt %49 : vector<1x128xf32>
    %51 = arith.mulf %47, %50 : vector<1x128xf32>
    %52 = vector.broadcast %51 : vector<1x128xf32> to vector<8x128xf32>
    %53 = arith.mulf %41, %52 : vector<8x128xf32>
    %c9 = arith.constant 9 : index
    %c0_30 = arith.constant 0 : index
    %54 = vector.load %arg2[%c9, %c0_30] : memref<18x128xf32, #tpu.memory_space<vmem>>, vector<1x128xf32>
    %55 = vector.broadcast %54 : vector<1x128xf32> to vector<8x128xf32>
    %56 = arith.addf %53, %55 : vector<8x128xf32>
    %cst_31 = arith.constant 0.000000e+00 : f32
    %57 = vector.broadcast %cst_31 : f32 to vector<8x128xf32>
    %58 = arith.maximumf %56, %57 : vector<8x128xf32>
    %59 = arith.truncf %58 : vector<8x128xf32> to vector<8x128xbf16>
    %c2 = arith.constant 2 : index
    %c0_32 = arith.constant 0 : index
    %c0_33 = arith.constant 0 : index
    %60 = vector.load %arg1[%c2, %c0_32, %c0_33] : memref<10x128x128xbf16, #tpu.memory_space<vmem>>, vector<1x128x128xbf16>
    %61 = vector.shape_cast %60 : vector<1x128x128xbf16> to vector<128x128xbf16>
    %cst_34 = arith.constant dense<0.000000e+00> : vector<8x128xf32>
    %62 = tpu.matmul %59, %61, %cst_34 {dimension_numbers = #tpu.dot_dimension_numbers<[1], [0], [0], [1], [0, 0, 1, 1], [], []>} : vector<8x128xbf16>, vector<128x128xbf16>, vector<8x128xf32> -> vector<8x128xf32>
    %cst_35 = arith.constant dense<0.000000e+00> : vector<128xf32>
    %63 = vector.multi_reduction <add>, %62, %cst_35 [0] : vector<8x128xf32> to vector<128xf32>
    %64 = vector.shape_cast %63 : vector<128xf32> to vector<1x128xf32>
    %cst_36 = arith.constant 1.250000e-01 : f32
    %65 = vector.broadcast %cst_36 : f32 to vector<1x128xf32>
    %66 = arith.mulf %64, %65 : vector<1x128xf32>
    %67 = vector.broadcast %66 : vector<1x128xf32> to vector<8x128xf32>
    %68 = arith.subf %62, %67 : vector<8x128xf32>
    %69 = arith.mulf %68, %68 : vector<8x128xf32>
    %cst_37 = arith.constant dense<0.000000e+00> : vector<128xf32>
    %70 = vector.multi_reduction <add>, %69, %cst_37 [0] : vector<8x128xf32> to vector<128xf32>
    %71 = vector.shape_cast %70 : vector<128xf32> to vector<1x128xf32>
    %cst_38 = arith.constant 1.250000e-01 : f32
    %72 = vector.broadcast %cst_38 : f32 to vector<1x128xf32>
    %73 = arith.mulf %71, %72 : vector<1x128xf32>
    %c2_39 = arith.constant 2 : index
    %c0_40 = arith.constant 0 : index
    %74 = vector.load %arg2[%c2_39, %c0_40] : memref<18x128xf32, #tpu.memory_space<vmem>>, vector<1x128xf32>
    %cst_41 = arith.constant 9.99999974E-6 : f32
    %75 = vector.broadcast %cst_41 : f32 to vector<1x128xf32>
    %76 = arith.addf %73, %75 : vector<1x128xf32>
    %77 = math.rsqrt %76 : vector<1x128xf32>
    %78 = arith.mulf %74, %77 : vector<1x128xf32>
    %79 = vector.broadcast %78 : vector<1x128xf32> to vector<8x128xf32>
    %80 = arith.mulf %68, %79 : vector<8x128xf32>
    %c10 = arith.constant 10 : index
    %c0_42 = arith.constant 0 : index
    %81 = vector.load %arg2[%c10, %c0_42] : memref<18x128xf32, #tpu.memory_space<vmem>>, vector<1x128xf32>
    %82 = vector.broadcast %81 : vector<1x128xf32> to vector<8x128xf32>
    %83 = arith.addf %80, %82 : vector<8x128xf32>
    %cst_43 = arith.constant 0.000000e+00 : f32
    %84 = vector.broadcast %cst_43 : f32 to vector<8x128xf32>
    %85 = arith.maximumf %83, %84 : vector<8x128xf32>
    %86 = arith.truncf %85 : vector<8x128xf32> to vector<8x128xbf16>
    %c3 = arith.constant 3 : index
    %c0_44 = arith.constant 0 : index
    %c0_45 = arith.constant 0 : index
    %87 = vector.load %arg1[%c3, %c0_44, %c0_45] : memref<10x128x128xbf16, #tpu.memory_space<vmem>>, vector<1x128x128xbf16>
    %88 = vector.shape_cast %87 : vector<1x128x128xbf16> to vector<128x128xbf16>
    %cst_46 = arith.constant dense<0.000000e+00> : vector<8x128xf32>
    %89 = tpu.matmul %86, %88, %cst_46 {dimension_numbers = #tpu.dot_dimension_numbers<[1], [0], [0], [1], [0, 0, 1, 1], [], []>} : vector<8x128xbf16>, vector<128x128xbf16>, vector<8x128xf32> -> vector<8x128xf32>
    %cst_47 = arith.constant dense<0.000000e+00> : vector<128xf32>
    %90 = vector.multi_reduction <add>, %89, %cst_47 [0] : vector<8x128xf32> to vector<128xf32>
    %91 = vector.shape_cast %90 : vector<128xf32> to vector<1x128xf32>
    %cst_48 = arith.constant 1.250000e-01 : f32
    %92 = vector.broadcast %cst_48 : f32 to vector<1x128xf32>
    %93 = arith.mulf %91, %92 : vector<1x128xf32>
    %94 = vector.broadcast %93 : vector<1x128xf32> to vector<8x128xf32>
    %95 = arith.subf %89, %94 : vector<8x128xf32>
    %96 = arith.mulf %95, %95 : vector<8x128xf32>
    %cst_49 = arith.constant dense<0.000000e+00> : vector<128xf32>
    %97 = vector.multi_reduction <add>, %96, %cst_49 [0] : vector<8x128xf32> to vector<128xf32>
    %98 = vector.shape_cast %97 : vector<128xf32> to vector<1x128xf32>
    %cst_50 = arith.constant 1.250000e-01 : f32
    %99 = vector.broadcast %cst_50 : f32 to vector<1x128xf32>
    %100 = arith.mulf %98, %99 : vector<1x128xf32>
    %c3_51 = arith.constant 3 : index
    %c0_52 = arith.constant 0 : index
    %101 = vector.load %arg2[%c3_51, %c0_52] : memref<18x128xf32, #tpu.memory_space<vmem>>, vector<1x128xf32>
    %cst_53 = arith.constant 9.99999974E-6 : f32
    %102 = vector.broadcast %cst_53 : f32 to vector<1x128xf32>
    %103 = arith.addf %100, %102 : vector<1x128xf32>
    %104 = math.rsqrt %103 : vector<1x128xf32>
    %105 = arith.mulf %101, %104 : vector<1x128xf32>
    %106 = vector.broadcast %105 : vector<1x128xf32> to vector<8x128xf32>
    %107 = arith.mulf %95, %106 : vector<8x128xf32>
    %c11 = arith.constant 11 : index
    %c0_54 = arith.constant 0 : index
    %108 = vector.load %arg2[%c11, %c0_54] : memref<18x128xf32, #tpu.memory_space<vmem>>, vector<1x128xf32>
    %109 = vector.broadcast %108 : vector<1x128xf32> to vector<8x128xf32>
    %110 = arith.addf %107, %109 : vector<8x128xf32>
    %cst_55 = arith.constant 0.000000e+00 : f32
    %111 = vector.broadcast %cst_55 : f32 to vector<8x128xf32>
    %112 = arith.maximumf %110, %111 : vector<8x128xf32>
    %113 = arith.truncf %112 : vector<8x128xf32> to vector<8x128xbf16>
    %c4 = arith.constant 4 : index
    %c0_56 = arith.constant 0 : index
    %c0_57 = arith.constant 0 : index
    %114 = vector.load %arg1[%c4, %c0_56, %c0_57] : memref<10x128x128xbf16, #tpu.memory_space<vmem>>, vector<1x128x128xbf16>
    %115 = vector.shape_cast %114 : vector<1x128x128xbf16> to vector<128x128xbf16>
    %cst_58 = arith.constant dense<0.000000e+00> : vector<8x128xf32>
    %116 = tpu.matmul %113, %115, %cst_58 {dimension_numbers = #tpu.dot_dimension_numbers<[1], [0], [0], [1], [0, 0, 1, 1], [], []>} : vector<8x128xbf16>, vector<128x128xbf16>, vector<8x128xf32> -> vector<8x128xf32>
    %c16 = arith.constant 16 : index
    %c0_59 = arith.constant 0 : index
    %117 = vector.load %arg2[%c16, %c0_59] : memref<18x128xf32, #tpu.memory_space<vmem>>, vector<1x128xf32>
    %118 = vector.broadcast %117 : vector<1x128xf32> to vector<8x128xf32>
    %119 = arith.addf %116, %118 : vector<8x128xf32>
    %120 = vector.extract_strided_slice %119 {offsets = [0, 0], sizes = [8, 16], strides = [1, 1]} : vector<8x128xf32> to vector<8x16xf32>
    %c0_60 = arith.constant 0 : index
    %c0_61 = arith.constant 0 : index
    %121 = vector.load %arg6[%c0_60, %c0_61] : memref<8x16xf32, #tpu.memory_space<vmem>>, vector<8x16xf32>
    tpu.vector_store %arg6[%c0_60, %c0_61], %120 {strides = array<i32>} : memref<8x16xf32, #tpu.memory_space<vmem>>, vector<8x16xf32>,
    tpu.enqueue_dma source(%arg6 : memref<8x16xf32, #tpu.memory_space<vmem>>) target(%arg4 : memref<8x16xf32, #tpu.memory_space<any>>) target_semaphore(%arg7 : memref<!tpu.dma_semaphore, #tpu.memory_space<semaphore_mem>>)
    %122 = arith.truncf %119 : vector<8x128xf32> to vector<8x128xbf16>
    %c5 = arith.constant 5 : index
    %c0_62 = arith.constant 0 : index
    %c0_63 = arith.constant 0 : index
    %123 = vector.load %arg1[%c5, %c0_62, %c0_63] : memref<10x128x128xbf16, #tpu.memory_space<vmem>>, vector<1x128x128xbf16>
    %124 = vector.shape_cast %123 : vector<1x128x128xbf16> to vector<128x128xbf16>
    %cst_64 = arith.constant dense<0.000000e+00> : vector<8x128xf32>
    %125 = tpu.matmul %122, %124, %cst_64 {dimension_numbers = #tpu.dot_dimension_numbers<[1], [0], [0], [1], [0, 0, 1, 1], [], []>} : vector<8x128xbf16>, vector<128x128xbf16>, vector<8x128xf32> -> vector<8x128xf32>
    %cst_65 = arith.constant dense<0.000000e+00> : vector<128xf32>
    %126 = vector.multi_reduction <add>, %125, %cst_65 [0] : vector<8x128xf32> to vector<128xf32>
    %127 = vector.shape_cast %126 : vector<128xf32> to vector<1x128xf32>
    %cst_66 = arith.constant 1.250000e-01 : f32
    %128 = vector.broadcast %cst_66 : f32 to vector<1x128xf32>
    %129 = arith.mulf %127, %128 : vector<1x128xf32>
    %130 = vector.broadcast %129 : vector<1x128xf32> to vector<8x128xf32>
    %131 = arith.subf %125, %130 : vector<8x128xf32>
    %132 = arith.mulf %131, %131 : vector<8x128xf32>
    %cst_67 = arith.constant dense<0.000000e+00> : vector<128xf32>
    %133 = vector.multi_reduction <add>, %132, %cst_67 [0] : vector<8x128xf32> to vector<128xf32>
    %134 = vector.shape_cast %133 : vector<128xf32> to vector<1x128xf32>
    %cst_68 = arith.constant 1.250000e-01 : f32
    %135 = vector.broadcast %cst_68 : f32 to vector<1x128xf32>
    %136 = arith.mulf %134, %135 : vector<1x128xf32>
    %c4_69 = arith.constant 4 : index
    %c0_70 = arith.constant 0 : index
    %137 = vector.load %arg2[%c4_69, %c0_70] : memref<18x128xf32, #tpu.memory_space<vmem>>, vector<1x128xf32>
    %cst_71 = arith.constant 9.99999974E-6 : f32
    %138 = vector.broadcast %cst_71 : f32 to vector<1x128xf32>
    %139 = arith.addf %136, %138 : vector<1x128xf32>
    %140 = math.rsqrt %139 : vector<1x128xf32>
    %141 = arith.mulf %137, %140 : vector<1x128xf32>
    %142 = vector.broadcast %141 : vector<1x128xf32> to vector<8x128xf32>
    %143 = arith.mulf %131, %142 : vector<8x128xf32>
    %c12 = arith.constant 12 : index
    %c0_72 = arith.constant 0 : index
    %144 = vector.load %arg2[%c12, %c0_72] : memref<18x128xf32, #tpu.memory_space<vmem>>, vector<1x128xf32>
    %145 = vector.broadcast %144 : vector<1x128xf32> to vector<8x128xf32>
    %146 = arith.addf %143, %145 : vector<8x128xf32>
    %cst_73 = arith.constant 0.000000e+00 : f32
    %147 = vector.broadcast %cst_73 : f32 to vector<8x128xf32>
    %148 = arith.maximumf %146, %147 : vector<8x128xf32>
    %149 = arith.truncf %148 : vector<8x128xf32> to vector<8x128xbf16>
    %c6 = arith.constant 6 : index
    %c0_74 = arith.constant 0 : index
    %c0_75 = arith.constant 0 : index
    %150 = vector.load %arg1[%c6, %c0_74, %c0_75] : memref<10x128x128xbf16, #tpu.memory_space<vmem>>, vector<1x128x128xbf16>
    %151 = vector.shape_cast %150 : vector<1x128x128xbf16> to vector<128x128xbf16>
    %cst_76 = arith.constant dense<0.000000e+00> : vector<8x128xf32>
    %152 = tpu.matmul %149, %151, %cst_76 {dimension_numbers = #tpu.dot_dimension_numbers<[1], [0], [0], [1], [0, 0, 1, 1], [], []>} : vector<8x128xbf16>, vector<128x128xbf16>, vector<8x128xf32> -> vector<8x128xf32>
    %cst_77 = arith.constant dense<0.000000e+00> : vector<128xf32>
    %153 = vector.multi_reduction <add>, %152, %cst_77 [0] : vector<8x128xf32> to vector<128xf32>
    %154 = vector.shape_cast %153 : vector<128xf32> to vector<1x128xf32>
    %cst_78 = arith.constant 1.250000e-01 : f32
    %155 = vector.broadcast %cst_78 : f32 to vector<1x128xf32>
    %156 = arith.mulf %154, %155 : vector<1x128xf32>
    %157 = vector.broadcast %156 : vector<1x128xf32> to vector<8x128xf32>
    %158 = arith.subf %152, %157 : vector<8x128xf32>
    %159 = arith.mulf %158, %158 : vector<8x128xf32>
    %cst_79 = arith.constant dense<0.000000e+00> : vector<128xf32>
    %160 = vector.multi_reduction <add>, %159, %cst_79 [0] : vector<8x128xf32> to vector<128xf32>
    %161 = vector.shape_cast %160 : vector<128xf32> to vector<1x128xf32>
    %cst_80 = arith.constant 1.250000e-01 : f32
    %162 = vector.broadcast %cst_80 : f32 to vector<1x128xf32>
    %163 = arith.mulf %161, %162 : vector<1x128xf32>
    %c5_81 = arith.constant 5 : index
    %c0_82 = arith.constant 0 : index
    %164 = vector.load %arg2[%c5_81, %c0_82] : memref<18x128xf32, #tpu.memory_space<vmem>>, vector<1x128xf32>
    %cst_83 = arith.constant 9.99999974E-6 : f32
    %165 = vector.broadcast %cst_83 : f32 to vector<1x128xf32>
    %166 = arith.addf %163, %165 : vector<1x128xf32>
    %167 = math.rsqrt %166 : vector<1x128xf32>
    %168 = arith.mulf %164, %167 : vector<1x128xf32>
    %169 = vector.broadcast %168 : vector<1x128xf32> to vector<8x128xf32>
    %170 = arith.mulf %158, %169 : vector<8x128xf32>
    %c13 = arith.constant 13 : index
    %c0_84 = arith.constant 0 : index
    %171 = vector.load %arg2[%c13, %c0_84] : memref<18x128xf32, #tpu.memory_space<vmem>>, vector<1x128xf32>
    %172 = vector.broadcast %171 : vector<1x128xf32> to vector<8x128xf32>
    %173 = arith.addf %170, %172 : vector<8x128xf32>
    %cst_85 = arith.constant 0.000000e+00 : f32
    %174 = vector.broadcast %cst_85 : f32 to vector<8x128xf32>
    %175 = arith.maximumf %173, %174 : vector<8x128xf32>
    %176 = arith.truncf %175 : vector<8x128xf32> to vector<8x128xbf16>
    %c7 = arith.constant 7 : index
    %c0_86 = arith.constant 0 : index
    %c0_87 = arith.constant 0 : index
    %177 = vector.load %arg1[%c7, %c0_86, %c0_87] : memref<10x128x128xbf16, #tpu.memory_space<vmem>>, vector<1x128x128xbf16>
    %178 = vector.shape_cast %177 : vector<1x128x128xbf16> to vector<128x128xbf16>
    %cst_88 = arith.constant dense<0.000000e+00> : vector<8x128xf32>
    %179 = tpu.matmul %176, %178, %cst_88 {dimension_numbers = #tpu.dot_dimension_numbers<[1], [0], [0], [1], [0, 0, 1, 1], [], []>} : vector<8x128xbf16>, vector<128x128xbf16>, vector<8x128xf32> -> vector<8x128xf32>
    %cst_89 = arith.constant dense<0.000000e+00> : vector<128xf32>
    %180 = vector.multi_reduction <add>, %179, %cst_89 [0] : vector<8x128xf32> to vector<128xf32>
    %181 = vector.shape_cast %180 : vector<128xf32> to vector<1x128xf32>
    %cst_90 = arith.constant 1.250000e-01 : f32
    %182 = vector.broadcast %cst_90 : f32 to vector<1x128xf32>
    %183 = arith.mulf %181, %182 : vector<1x128xf32>
    %184 = vector.broadcast %183 : vector<1x128xf32> to vector<8x128xf32>
    %185 = arith.subf %179, %184 : vector<8x128xf32>
    %186 = arith.mulf %185, %185 : vector<8x128xf32>
    %cst_91 = arith.constant dense<0.000000e+00> : vector<128xf32>
    %187 = vector.multi_reduction <add>, %186, %cst_91 [0] : vector<8x128xf32> to vector<128xf32>
    %188 = vector.shape_cast %187 : vector<128xf32> to vector<1x128xf32>
    %cst_92 = arith.constant 1.250000e-01 : f32
    %189 = vector.broadcast %cst_92 : f32 to vector<1x128xf32>
    %190 = arith.mulf %188, %189 : vector<1x128xf32>
    %c6_93 = arith.constant 6 : index
    %c0_94 = arith.constant 0 : index
    %191 = vector.load %arg2[%c6_93, %c0_94] : memref<18x128xf32, #tpu.memory_space<vmem>>, vector<1x128xf32>
    %cst_95 = arith.constant 9.99999974E-6 : f32
    %192 = vector.broadcast %cst_95 : f32 to vector<1x128xf32>
    %193 = arith.addf %190, %192 : vector<1x128xf32>
    %194 = math.rsqrt %193 : vector<1x128xf32>
    %195 = arith.mulf %191, %194 : vector<1x128xf32>
    %196 = vector.broadcast %195 : vector<1x128xf32> to vector<8x128xf32>
    %197 = arith.mulf %185, %196 : vector<8x128xf32>
    %c14 = arith.constant 14 : index
    %c0_96 = arith.constant 0 : index
    %198 = vector.load %arg2[%c14, %c0_96] : memref<18x128xf32, #tpu.memory_space<vmem>>, vector<1x128xf32>
    %199 = vector.broadcast %198 : vector<1x128xf32> to vector<8x128xf32>
    %200 = arith.addf %197, %199 : vector<8x128xf32>
    %cst_97 = arith.constant 0.000000e+00 : f32
    %201 = vector.broadcast %cst_97 : f32 to vector<8x128xf32>
    %202 = arith.maximumf %200, %201 : vector<8x128xf32>
    %203 = arith.truncf %202 : vector<8x128xf32> to vector<8x128xbf16>
    %c8_98 = arith.constant 8 : index
    %c0_99 = arith.constant 0 : index
    %c0_100 = arith.constant 0 : index
    %204 = vector.load %arg1[%c8_98, %c0_99, %c0_100] : memref<10x128x128xbf16, #tpu.memory_space<vmem>>, vector<1x128x128xbf16>
    %205 = vector.shape_cast %204 : vector<1x128x128xbf16> to vector<128x128xbf16>
    %cst_101 = arith.constant dense<0.000000e+00> : vector<8x128xf32>
    %206 = tpu.matmul %203, %205, %cst_101 {dimension_numbers = #tpu.dot_dimension_numbers<[1], [0], [0], [1], [0, 0, 1, 1], [], []>} : vector<8x128xbf16>, vector<128x128xbf16>, vector<8x128xf32> -> vector<8x128xf32>
    %cst_102 = arith.constant dense<0.000000e+00> : vector<128xf32>
    %207 = vector.multi_reduction <add>, %206, %cst_102 [0] : vector<8x128xf32> to vector<128xf32>
    %208 = vector.shape_cast %207 : vector<128xf32> to vector<1x128xf32>
    %cst_103 = arith.constant 1.250000e-01 : f32
    %209 = vector.broadcast %cst_103 : f32 to vector<1x128xf32>
    %210 = arith.mulf %208, %209 : vector<1x128xf32>
    %211 = vector.broadcast %210 : vector<1x128xf32> to vector<8x128xf32>
    %212 = arith.subf %206, %211 : vector<8x128xf32>
    %213 = arith.mulf %212, %212 : vector<8x128xf32>
    %cst_104 = arith.constant dense<0.000000e+00> : vector<128xf32>
    %214 = vector.multi_reduction <add>, %213, %cst_104 [0] : vector<8x128xf32> to vector<128xf32>
    %215 = vector.shape_cast %214 : vector<128xf32> to vector<1x128xf32>
    %cst_105 = arith.constant 1.250000e-01 : f32
    %216 = vector.broadcast %cst_105 : f32 to vector<1x128xf32>
    %217 = arith.mulf %215, %216 : vector<1x128xf32>
    %c7_106 = arith.constant 7 : index
    %c0_107 = arith.constant 0 : index
    %218 = vector.load %arg2[%c7_106, %c0_107] : memref<18x128xf32, #tpu.memory_space<vmem>>, vector<1x128xf32>
    %cst_108 = arith.constant 9.99999974E-6 : f32
    %219 = vector.broadcast %cst_108 : f32 to vector<1x128xf32>
    %220 = arith.addf %217, %219 : vector<1x128xf32>
    %221 = math.rsqrt %220 : vector<1x128xf32>
    %222 = arith.mulf %218, %221 : vector<1x128xf32>
    %223 = vector.broadcast %222 : vector<1x128xf32> to vector<8x128xf32>
    %224 = arith.mulf %212, %223 : vector<8x128xf32>
    %c15 = arith.constant 15 : index
    %c0_109 = arith.constant 0 : index
    %225 = vector.load %arg2[%c15, %c0_109] : memref<18x128xf32, #tpu.memory_space<vmem>>, vector<1x128xf32>
    %226 = vector.broadcast %225 : vector<1x128xf32> to vector<8x128xf32>
    %227 = arith.addf %224, %226 : vector<8x128xf32>
    %cst_110 = arith.constant 0.000000e+00 : f32
    %228 = vector.broadcast %cst_110 : f32 to vector<8x128xf32>
    %229 = arith.maximumf %227, %228 : vector<8x128xf32>
    %230 = arith.truncf %229 : vector<8x128xf32> to vector<8x128xbf16>
    %c9_111 = arith.constant 9 : index
    %c0_112 = arith.constant 0 : index
    %c0_113 = arith.constant 0 : index
    %231 = vector.load %arg1[%c9_111, %c0_112, %c0_113] : memref<10x128x128xbf16, #tpu.memory_space<vmem>>, vector<1x128x128xbf16>
    %232 = vector.shape_cast %231 : vector<1x128x128xbf16> to vector<128x128xbf16>
    %cst_114 = arith.constant dense<0.000000e+00> : vector<8x128xf32>
    %233 = tpu.matmul %230, %232, %cst_114 {dimension_numbers = #tpu.dot_dimension_numbers<[1], [0], [0], [1], [0, 0, 1, 1], [], []>} : vector<8x128xbf16>, vector<128x128xbf16>, vector<8x128xf32> -> vector<8x128xf32>
    %c17 = arith.constant 17 : index
    %c0_115 = arith.constant 0 : index
    %234 = vector.load %arg2[%c17, %c0_115] : memref<18x128xf32, #tpu.memory_space<vmem>>, vector<1x128xf32>
    %235 = vector.broadcast %234 : vector<1x128xf32> to vector<8x128xf32>
    %236 = arith.addf %233, %235 : vector<8x128xf32>
    %237 = vector.extract_strided_slice %236 {offsets = [0, 0], sizes = [8, 70], strides = [1, 1]} : vector<8x128xf32> to vector<8x70xf32>
    %c0_116 = arith.constant 0 : index
    %c0_117 = arith.constant 0 : index
    %238 = vector.load %arg3[%c0_116, %c0_117] : memref<8x70xf32, #tpu.memory_space<vmem>>, vector<8x70xf32>
    tpu.vector_store %arg3[%c0_116, %c0_117], %237 {strides = array<i32>} : memref<8x70xf32, #tpu.memory_space<vmem>>, vector<8x70xf32>,
    tpu.wait_dma2 semaphore(%arg7 : memref<!tpu.dma_semaphore, #tpu.memory_space<semaphore_mem>>) src(%arg6 : memref<8x16xf32, #tpu.memory_space<vmem>>) dst(%arg4 : memref<8x16xf32, #tpu.memory_space<any>>)
    return
  }
}

</mosaic_0001>

<bundles_post_ra>
// kernel: autoencoder_forward.1
= control target key start
LH: loop header
LB: loop body
LE: loop exit
PB: predicated region body
PF: predicated region fallthrough
CT: control target
= control target key end

     0   :  { %10 = vsyncpa [#allocation6], 0  ;;  %s1800_s0 = inlined_call_operand.hbm [shape: f32[8,70], index: 0, kind: input, shape index: {}]   ;;  %s1801_s1 = inlined_call_operand.hbm [shape: bf16[10,128,128], index: 1, kind: input, shape index: {}]   ;;  %s1802_s2 = inlined_call_operand.hbm [shape: f32[18,128], index: 2, kind: input, shape index: {}]   ;;  %s1803_s3 = inlined_call_operand.hbm [shape: f32[8,70], index: 3, kind: output, shape index: {0}]   ;;  %s1804_s4 = inlined_call_operand.hbm [shape: f32[8,16], index: 4, kind: output, shape index: {1}]  }
   0x1   :  { %11 = vsyncpa [#allocation9], 0  ;;  %s28_s17 = sshll.u32 %s1801_s1, 4  ;;  %s29_s17 = int_to_ptr.hbm [resolvable:$true] %s28_s17 }
   0x2   :  { %12 = vsyncpa [#allocation7], 0  ;;  %s1748_s18 = smov [#allocation8]   ;;  %s18_s22 = sshll.u32 %s1800_s0, 4  ;;  %s19_s22 = int_to_ptr.hbm [resolvable:$true] %s18_s22 }
   0x3   :  { %s30_s19 = sshll.u32 %s1748_s18, 4  ;;  %s1749_s23 = smov 64   ;;  %s31_s19 = int_to_ptr.vmem [resolvable:$true] %s30_s19 }
   0x4   :  { %s1750_s24 = smov 4   ;;  %s1751_s25 = smov [#allocation5]  }
   0x5   :  { %36 = dma.hbm_to_vmem [thread:$0]  %s29_s17, 10240, %s31_s19, [#allocation9], %s1749_s23, %s1749_s23, %s1750_s24  }
   0x6   :  { %s20_s26 = sshll.u32 %s1751_s25, 4  ;;  %s41_s29 = sshll.u32 %s1802_s2, 4  ;;  %s21_s26 = int_to_ptr.vmem [resolvable:$true] %s20_s26  ;;  %s42_s29 = int_to_ptr.hbm [resolvable:$true] %s41_s29 }
   0x7   :  { %23 = dma.hbm_to_vmem [thread:$0]  %s19_s22, 128, %s21_s26, [#allocation6]  }
   0x8   :  { %s1752_s1 = smov [#allocation10]   ;;  %s1753_s5 = smov 128  }
   0x9   :  { %s43_s30 = sshll.u32 %s1752_s1, 4  ;;  %s1754_s6 = smov 8   ;;  %s44_s30 = int_to_ptr.vmem [resolvable:$true] %s43_s30 }
   0xa   :  { %49 = dma.hbm_to_vmem [thread:$0]  %s42_s29, 384, %s44_s30, [#allocation9], %s1753_s5, %s1753_s5, %s1754_s6  }
   0xb   :  { %1740 = dma.done.wait [#allocation6], 128  }
   0xc   :  { %1741 = vsyncadd [#allocation6], 4294967168 }
   0xd   :  { %1742 = dma.done.wait [#allocation9], 10624  }
   0xe   :  { %1743 = vsyncadd [#allocation9], 4294956672  ;;  %v1755_v0 = vmov 0.0   ;;  %v1511_v1 = vld [vmem:[#allocation8 + $0x38] sm:$0xff]  ;;  %vm64_vm0 = vcmask 572416   ;;  %v1510_v2 = vld [vmem:[#allocation8 + $0x30] sm:$0xff] }
   0xf   :  { %62 = vst [vmem:[#allocation2] sm:$0xff] %v1755_v0  ;;  %132 = vmatpush.bf16.msra.mxu0 %v1511_v1  ;;  %v63_v3 = vld [vmem:[#allocation5] sm:$0xff]  ;;  %v1509_v4 = vld [vmem:[#allocation8 + $0x28] sm:$0xff]  ;;  %v1508_v5 = vld [vmem:[#allocation8 + $0x20] sm:$0xff]  ;;  %vm603_vm13 = vcmask 130048   ;;  %s614_s7 = sshll.u32 %s1804_s4, 4  ;;  %s615_s7 = int_to_ptr.hbm [resolvable:$true] %s614_s7 }
  0x10   :  { %65 = vst.msk [vmem:[#allocation2] sm:$0xff] %vm64_vm0, %v63_v3  ;;  %v1507_v6 = vld [vmem:[#allocation8 + $0x18] sm:$0xff]  ;;  %v1506_v7 = vld [vmem:[#allocation8 + $0x10] sm:$0xff]  ;;  %v1505_v8 = vld [vmem:[#allocation8 + $0x8] sm:$0xff]  ;;  %s1756_s8 = smov [#allocation3]  }
  0x11   :  { %v1504_v9 = vld [vmem:[#allocation8] sm:$0xff]  ;;  %v1519_v13 = vld [vmem:[#allocation8 + $0x78] sm:$0xff]  ;;  %v1518_v16 = vld [vmem:[#allocation8 + $0x70] sm:$0xff]  ;;  %s612_s9 = sshll.u32 %s1756_s8, 4  ;;  %s613_s9 = int_to_ptr.vmem [resolvable:$true] %s612_s9 }
  0x12   :  { %246 = vmatpush.bf16.msra.mxu1 %v1519_v13  ;;  %v1517_v20 = vld [vmem:[#allocation8 + $0x68] sm:$0xff]  ;;  %v1516_v22 = vld [vmem:[#allocation8 + $0x60] sm:$0xff]  ;;  %v1515_v25 = vld [vmem:[#allocation8 + $0x58] sm:$0xff] }
  0x13   :  { %133 = vmatpush.bf16.msra.mxu0 %v1510_v2  ;;  %v1514_v28 = vld [vmem:[#allocation8 + $0x50] sm:$0xff]  ;;  %v1513_v31 = vld [vmem:[#allocation8 + $0x48] sm:$0xff]  ;;  %v1512_v34 = vld [vmem:[#allocation8 + $0x40] sm:$0xff] }
  0x14   :  { %v161_v44 = vld [vmem:[#allocation10] sm:$0x1]  ;;  %v1594_v49 = vld [vmem:[#allocation10 + $0x8] ss:$0 sm:$0xff]  ;;  %v1527_v55 = vld [vmem:[#allocation8 + $0xb8] sm:$0xff] }
  0x15   :  { %360 = vmatpush.bf16.msra.mxu2 %v1527_v55  ;;  %v1526_v58 = vld [vmem:[#allocation8 + $0xb0] sm:$0xff]  ;;  %v1525_v62 = vld [vmem:[#allocation8 + $0xa8] sm:$0xff]  ;;  %v1524_v0 = vld [vmem:[#allocation8 + $0xa0] sm:$0xff] }
  0x16   :  { %247 = vmatpush.bf16.msra.mxu1 %v1518_v16  ;;  %v1523_v3 = vld [vmem:[#allocation8 + $0x98] sm:$0xff] }
  0x17   :  { %134 = vmatpush.bf16.msra.mxu0 %v1509_v4  ;;  %v66_v10 = vld [vmem:[#allocation2] sm:$0xff] }
  0x18   :  { %v67_v11 = vpack.c.bf16 %v66_v10, %v66_v10 }
  0x19   :  { %361 = vmatpush.bf16.msra.mxu2 %v1526_v58 }
  0x1a   :  { %248 = vmatpush.bf16.msra.mxu1 %v1517_v20 }
  0x1b   :  { %135 = vmatpush.bf16.msra.mxu0 %v1508_v5 }
  0x1d   :  { %362 = vmatpush.bf16.msra.mxu2 %v1525_v62 }
  0x1e   :  { %249 = vmatpush.bf16.msra.mxu1 %v1516_v22  ;;  %v275_v22 = vld [vmem:[#allocation10 + $0x1] sm:$0x1] }
  0x1f   :  { %136 = vmatpush.bf16.msra.mxu0 %v1507_v6  ;;  %v1522_v6 = vld [vmem:[#allocation8 + $0x90] sm:$0xff] }
  0x21   :  { %363 = vmatpush.bf16.msra.mxu2 %v1524_v0  ;;  %v389_v0 = vld [vmem:[#allocation10 + $0x2] sm:$0x1] }
  0x22   :  { %250 = vmatpush.bf16.msra.mxu1 %v1515_v25 }
  0x23   :  { %137 = vmatpush.bf16.msra.mxu0 %v1506_v7 }
  0x25   :  { %364 = vmatpush.bf16.msra.mxu2 %v1523_v3 }
  0x26   :  { %251 = vmatpush.bf16.msra.mxu1 %v1514_v28 }
  0x27   :  { %138 = vmatpush.bf16.msra.mxu0 %v1505_v8 }
  0x29   :  { %365 = vmatpush.bf16.msra.mxu2 %v1522_v6 }
  0x2a   :  { %252 = vmatpush.bf16.msra.mxu1 %v1513_v31 }
  0x2b   :  { %139 = vmatpush.bf16.msra.mxu0 %v1504_v9  ;;  %v1521_v9 = vld [vmem:[#allocation8 + $0x88] sm:$0xff] }
  0x2d   :  { %366 = vmatpush.bf16.msra.mxu2 %v1521_v9 }
  0x2e   :  { %140 = vmatmul.bf16.vlgmr.msra.gmra.mxu0 %v67_v11  ;;  %253 = vmatpush.bf16.msra.mxu1 %v1512_v34 }
  0xab   :  { %v141_v12 = vpop.f32.mrf.mxu0 }
  0xac   :  { %v145_v14 = vrot.slane %v141_v12, 4 }
  0xae   :  { %v146_v15 = vadd.f32 %v145_v14, %v141_v12 }
  0xb0   :  { %v147_v17 = vrot.slane %v146_v15, 2 }
  0xb2   :  { %v148_v18 = vadd.f32 %v147_v17, %v146_v15 }
  0xb3   :  { %v143_v19 = vpop.f32.mrf.mxu0 }
  0xb4   :  { %v149_v21 = vrot.slane %v148_v18, 1 }
  0xb6   :  { %v150_v23 = vadd.f32 %v149_v21, %v148_v18 }
  0xb8   :  { %v151_v24 = vmul.f32 0.125, %v150_v23 }
  0xba   :  { %v152_v26 = vsub.f32 %v141_v12, %v151_v24  ;;  %v1520_v12 = vld [vmem:[#allocation8 + $0x80] sm:$0xff] }
  0xbb   :  { %367 = vmatpush.bf16.msra.mxu2 %v1520_v12 }
  0xbc   :  { %v153_v27 = vmul.f32 %v152_v26, %v152_v26 }
  0xbe   :  { %v154_v29 = vrot.slane %v153_v27, 4 }
  0xc0   :  { %v155_v30 = vadd.f32 %v154_v29, %v153_v27  ;;  %v1595_v27 = vld [vmem:[#allocation10 + $0x9] ss:$0 sm:$0xff] }
  0xc2   :  { %v156_v32 = vrot.slane %v155_v30, 2 }
  0xc4   :  { %v157_v33 = vadd.f32 %v156_v32, %v155_v30 }
  0xc6   :  { %v158_v35 = vrot.slane %v157_v33, 1 }
  0xc8   :  { %v159_v36 = vadd.f32 %v158_v35, %v157_v33  ;;  %v1535_v33 = vld [vmem:[#allocation8 + $0xf8] sm:$0xff] }
  0xc9   :  { %474 = vmatpush.bf16.msra.mxu3 %v1535_v33 }
  0xca   :  { %v160_v37 = vmul.f32 0.125, %v159_v36  ;;  %v1534_v36 = vld [vmem:[#allocation8 + $0xf0] sm:$0xff] }
  0xcc   :  { %v162_v38 = vadd.f32 1e-05, %v160_v37 }
  0xcd   :  { %475 = vmatpush.bf16.msra.mxu3 %v1534_v36 }
  0xce   :  { %1604 = vrsqrt.f32 %v162_v38  ;;  %vm169_vm2 = vweird.f32 %v162_v38 }
  0xd4   :  { %v1605_v39 = vpop.eup %1604 }
  0xd5   :  { %v164_v40 = vmul.f32 %v1605_v39, %v162_v38  ;;  %vm170_vm1 = vweird.f32 %v1605_v39 }
  0xd6   :  { %vm171_vm3 = vmor %vm169_vm2, %vm170_vm1 }
  0xd7   :  { %v165_v41 = vmul.f32 %v1605_v39, %v164_v40  ;;  %v1533_v40 = vld [vmem:[#allocation8 + $0xe8] sm:$0xff] }
  0xd8   :  { %476 = vmatpush.bf16.msra.mxu3 %v1533_v40 }
  0xd9   :  { %v166_v42 = vmul.f32 0.5, %v165_v41 }
  0xdb   :  { %v167_v43 = vsub.f32 1.5, %v166_v42  ;;  %v1532_v42 = vld [vmem:[#allocation8 + $0xe0] sm:$0xff] }
  0xdc   :  { %477 = vmatpush.bf16.msra.mxu3 %v1532_v42  ;;  %v1548_v42 = vld [vmem:[#allocation8 + $0x160] sm:$0xff] }
  0xdd   :  { %v168_v45 = vmul.f32 %v1605_v39, %v167_v43 }
  0xdf   :  { %v172_v46 = vsel %vm171_vm3, %v1605_v39, %v168_v45  ;;  %v1531_v45 = vld [vmem:[#allocation8 + $0xd8] sm:$0xff] }
  0xe0   :  { %v173_v47 = vmul.f32 %v172_v46, %v161_v44  ;;  %478 = vmatpush.bf16.msra.mxu3 %v1531_v45  ;;  %v1547_v45 = vld [vmem:[#allocation8 + $0x158] sm:$0xff] }
  0xe2   :  { %v174_v48 = vperm.slane %v173_v47, 0 }
  0xe4   :  { %v175_v50 = vmul.f32 %v174_v48, %v152_v26  ;;  %v1530_v48 = vld [vmem:[#allocation8 + $0xd0] sm:$0xff] }
  0xe5   :  { %479 = vmatpush.bf16.msra.mxu3 %v1530_v48 }
  0xe6   :  { %v178_v51 = vadd.f32 %v1594_v49, %v175_v50 }
  0xe8   :  { %v179_v52 = vmax.f32 %v178_v51, 0.0  ;;  %v1529_v51 = vld [vmem:[#allocation8 + $0xc8] sm:$0xff] }
  0xe9   :  { %480 = vmatpush.bf16.msra.mxu3 %v1529_v51 }
  0xea   :  { %v180_v53 = vpack.c.bf16 %v179_v52, %v179_v52 }
  0xec   :  { %254 = vmatmul.bf16.vlgmr.msra.gmra.mxu1 %v180_v53 }
 0x169   :  { %v255_v54 = vpop.f32.mrf.mxu1 }
 0x16a   :  { %v259_v56 = vrot.slane %v255_v54, 4 }
 0x16c   :  { %v260_v57 = vadd.f32 %v259_v56, %v255_v54 }
 0x16e   :  { %v261_v59 = vrot.slane %v260_v57, 2 }
 0x170   :  { %v262_v60 = vadd.f32 %v261_v59, %v260_v57 }
 0x171   :  { %v257_v61 = vpop.f32.mrf.mxu1 }
 0x172   :  { %v263_v63 = vrot.slane %v262_v60, 1 }
 0x174   :  { %v264_v1 = vadd.f32 %v263_v63, %v262_v60 }
 0x176   :  { %v265_v2 = vmul.f32 0.125, %v264_v1 }
 0x178   :  { %v266_v4 = vsub.f32 %v255_v54, %v265_v2  ;;  %v1528_v54 = vld [vmem:[#allocation8 + $0xc0] sm:$0xff] }
 0x179   :  { %481 = vmatpush.bf16.msra.mxu3 %v1528_v54  ;;  %v1545_v54 = vld [vmem:[#allocation8 + $0x148] sm:$0xff] }
 0x17a   :  { %v267_v5 = vmul.f32 %v266_v4, %v266_v4 }
 0x17c   :  { %v268_v7 = vrot.slane %v267_v5, 4 }
 0x17e   :  { %v269_v8 = vadd.f32 %v268_v7, %v267_v5  ;;  %v1596_v5 = vld [vmem:[#allocation10 + $0xa] ss:$0 sm:$0xff] }
 0x180   :  { %v270_v10 = vrot.slane %v269_v8, 2 }
 0x182   :  { %v271_v11 = vadd.f32 %v270_v10, %v269_v8 }
 0x184   :  { %v272_v13 = vrot.slane %v271_v11, 1 }
 0x186   :  { %v273_v14 = vadd.f32 %v272_v13, %v271_v11  ;;  %v1543_v11 = vld [vmem:[#allocation8 + $0x138] sm:$0xff] }
 0x187   :  { %590 = vmatpush.bf16.msrb.mxu0 %v1543_v11 }
 0x188   :  { %v274_v15 = vmul.f32 0.125, %v273_v14  ;;  %v1542_v14 = vld [vmem:[#allocation8 + $0x130] sm:$0xff] }
 0x18a   :  { %v276_v16 = vadd.f32 1e-05, %v274_v15 }
 0x18b   :  { %591 = vmatpush.bf16.msrb.mxu0 %v1542_v14 }
 0x18c   :  { %1606 = vrsqrt.f32 %v276_v16  ;;  %vm283_vm5 = vweird.f32 %v276_v16 }
 0x192   :  { %v1607_v17 = vpop.eup %1606 }
 0x193   :  { %v278_v18 = vmul.f32 %v1607_v17, %v276_v16  ;;  %vm284_vm4 = vweird.f32 %v1607_v17 }
 0x194   :  { %vm285_vm6 = vmor %vm283_vm5, %vm284_vm4 }
 0x195   :  { %v279_v19 = vmul.f32 %v1607_v17, %v278_v18  ;;  %v1541_v18 = vld [vmem:[#allocation8 + $0x128] sm:$0xff] }
 0x196   :  { %592 = vmatpush.bf16.msrb.mxu0 %v1541_v18  ;;  %v1554_v18 = vld [vmem:[#allocation8 + $0x190] sm:$0xff] }
 0x197   :  { %v280_v20 = vmul.f32 0.5, %v279_v19 }
 0x199   :  { %v281_v21 = vsub.f32 1.5, %v280_v20 }
 0x19b   :  { %v282_v23 = vmul.f32 %v1607_v17, %v281_v21  ;;  %v1540_v21 = vld [vmem:[#allocation8 + $0x120] sm:$0xff] }
 0x19c   :  { %593 = vmatpush.bf16.msrb.mxu0 %v1540_v21  ;;  %v1553_v21 = vld [vmem:[#allocation8 + $0x188] sm:$0xff] }
 0x19d   :  { %v286_v24 = vsel %vm285_vm6, %v1607_v17, %v282_v23 }
 0x19e   :  { %v287_v25 = vmul.f32 %v286_v24, %v275_v22  ;;  %v1539_v24 = vld [vmem:[#allocation8 + $0x118] sm:$0xff] }
 0x1a0   :  { %v288_v26 = vperm.slane %v287_v25, 0  ;;  %594 = vmatpush.bf16.msrb.mxu0 %v1539_v24 }
 0x1a2   :  { %v289_v28 = vmul.f32 %v288_v26, %v266_v4 }
 0x1a4   :  { %v292_v29 = vadd.f32 %v1595_v27, %v289_v28  ;;  %v1538_v27 = vld [vmem:[#allocation8 + $0x110] sm:$0xff] }
 0x1a5   :  { %595 = vmatpush.bf16.msrb.mxu0 %v1538_v27 }
 0x1a6   :  { %v293_v30 = vmax.f32 %v292_v29, 0.0 }
 0x1a8   :  { %v294_v31 = vpack.c.bf16 %v293_v30, %v293_v30  ;;  %v1537_v30 = vld [vmem:[#allocation8 + $0x108] sm:$0xff] }
 0x1a9   :  { %596 = vmatpush.bf16.msrb.mxu0 %v1537_v30 }
 0x1aa   :  { %368 = vmatmul.bf16.vlgmr.msra.gmra.mxu2 %v294_v31 }
 0x22d   :  { %v369_v32 = vpop.f32.mrf.mxu2 }
 0x22e   :  { %v373_v34 = vrot.slane %v369_v32, 4 }
 0x230   :  { %v374_v35 = vadd.f32 %v373_v34, %v369_v32 }
 0x232   :  { %v375_v37 = vrot.slane %v374_v35, 2 }
 0x234   :  { %v376_v38 = vadd.f32 %v375_v37, %v374_v35  ;;  %v1551_v37 = vld [vmem:[#allocation8 + $0x178] sm:$0xff] }
 0x235   :  { %v371_v39 = vpop.f32.mrf.mxu2  ;;  %684 = vmatpush.bf16.msrb.mxu1 %v1551_v37 }
 0x236   :  { %v377_v41 = vrot.slane %v376_v38, 1  ;;  %v1549_v39 = vld [vmem:[#allocation8 + $0x168] sm:$0xff] }
 0x238   :  { %v378_v43 = vadd.f32 %v377_v41, %v376_v38  ;;  %v1550_v38 = vld [vmem:[#allocation8 + $0x170] sm:$0xff] }
 0x239   :  { %685 = vmatpush.bf16.msrb.mxu1 %v1550_v38  ;;  %v1599_v38 = vld [vmem:[#allocation10 + $0xc] ss:$0 sm:$0xff] }
 0x23a   :  { %v379_v44 = vmul.f32 0.125, %v378_v43 }
 0x23c   :  { %v380_v46 = vsub.f32 %v369_v32, %v379_v44  ;;  %v1536_v32 = vld [vmem:[#allocation8 + $0x100] sm:$0xff] }
 0x23d   :  { %597 = vmatpush.bf16.msrb.mxu0 %v1536_v32  ;;  %686 = vmatpush.bf16.msrb.mxu1 %v1549_v39 }
 0x23e   :  { %v381_v47 = vmul.f32 %v380_v46, %v380_v46 }
 0x240   :  { %v382_v49 = vrot.slane %v381_v47, 4 }
 0x241   :  { %687 = vmatpush.bf16.msrb.mxu1 %v1548_v42 }
 0x242   :  { %v383_v50 = vadd.f32 %v382_v49, %v381_v47  ;;  %v503_v47 = vld [vmem:[#allocation10 + $0x3] sm:$0x1]  ;;  %v1546_v49 = vld [vmem:[#allocation8 + $0x150] sm:$0xff] }
 0x244   :  { %v384_v52 = vrot.slane %v383_v50, 2 }
 0x245   :  { %688 = vmatpush.bf16.msrb.mxu1 %v1547_v45 }
 0x246   :  { %v385_v53 = vadd.f32 %v384_v52, %v383_v50 }
 0x248   :  { %v386_v55 = vrot.slane %v385_v53, 1 }
 0x249   :  { %689 = vmatpush.bf16.msrb.mxu1 %v1546_v49 }
 0x24a   :  { %v387_v56 = vadd.f32 %v386_v55, %v385_v53  ;;  %v1597_v53 = vld [vmem:[#allocation10 + $0xb] ss:$0 sm:$0xff] }
 0x24c   :  { %v388_v57 = vmul.f32 0.125, %v387_v56 }
 0x24d   :  { %690 = vmatpush.bf16.msrb.mxu1 %v1545_v54  ;;  %v1564_v54 = vld [vmem:[#allocation8 + $0x1e0] sm:$0xff] }
 0x24e   :  { %v390_v58 = vadd.f32 1e-05, %v388_v57 }
 0x250   :  { %1608 = vrsqrt.f32 %v390_v58  ;;  %vm397_vm8 = vweird.f32 %v390_v58 }
 0x256   :  { %v1609_v59 = vpop.eup %1608 }
 0x257   :  { %v392_v60 = vmul.f32 %v1609_v59, %v390_v58  ;;  %vm398_vm7 = vweird.f32 %v1609_v59 }
 0x258   :  { %vm399_vm9 = vmor %vm397_vm8, %vm398_vm7 }
 0x259   :  { %v393_v61 = vmul.f32 %v1609_v59, %v392_v60  ;;  %v1598_v60 = vld [vmem:[#allocation10 + $0x10] ss:$0 sm:$0xff] }
 0x25b   :  { %v394_v62 = vmul.f32 0.5, %v393_v61 }
 0x25d   :  { %v395_v63 = vsub.f32 1.5, %v394_v62 }
 0x25f   :  { %v396_v1 = vmul.f32 %v1609_v59, %v395_v63 }
 0x261   :  { %v400_v2 = vsel %vm399_vm9, %v1609_v59, %v396_v1  ;;  %v1544_v59 = vld [vmem:[#allocation8 + $0x140] sm:$0xff] }
 0x262   :  { %v401_v3 = vmul.f32 %v400_v2, %v389_v0  ;;  %691 = vmatpush.bf16.msrb.mxu1 %v1544_v59  ;;  %v1559_v2 = vld [vmem:[#allocation8 + $0x1b8] sm:$0xff] }
 0x263   :  { %798 = vmatpush.bf16.msrb.mxu2 %v1559_v2 }
 0x264   :  { %v402_v4 = vperm.slane %v401_v3, 0 }
 0x266   :  { %v403_v6 = vmul.f32 %v402_v4, %v380_v46 }
 0x268   :  { %v406_v7 = vadd.f32 %v1596_v5, %v403_v6  ;;  %v1558_v5 = vld [vmem:[#allocation8 + $0x1b0] sm:$0xff] }
 0x269   :  { %799 = vmatpush.bf16.msrb.mxu2 %v1558_v5 }
 0x26a   :  { %v407_v8 = vmax.f32 %v406_v7, 0.0 }
 0x26c   :  { %v408_v9 = vpack.c.bf16 %v407_v8, %v407_v8 }
 0x26e   :  { %482 = vmatmul.bf16.vlgmr.msra.gmra.mxu3 %v408_v9  ;;  %v1557_v9 = vld [vmem:[#allocation8 + $0x1a8] sm:$0xff] }
 0x26f   :  { %800 = vmatpush.bf16.msrb.mxu2 %v1557_v9 }
 0x2f1   :  { %v483_v10 = vpop.f32.mrf.mxu3 }
 0x2f2   :  { %v487_v12 = vrot.slane %v483_v10, 4 }
 0x2f4   :  { %v488_v13 = vadd.f32 %v487_v12, %v483_v10  ;;  %v1556_v12 = vld [vmem:[#allocation8 + $0x1a0] sm:$0xff] }
 0x2f5   :  { %801 = vmatpush.bf16.msrb.mxu2 %v1556_v12 }
 0x2f6   :  { %v489_v15 = vrot.slane %v488_v13, 2 }
 0x2f8   :  { %v490_v16 = vadd.f32 %v489_v15, %v488_v13  ;;  %v1555_v15 = vld [vmem:[#allocation8 + $0x198] sm:$0xff] }
 0x2f9   :  { %v485_v17 = vpop.f32.mrf.mxu3  ;;  %802 = vmatpush.bf16.msrb.mxu2 %v1555_v15 }
 0x2fa   :  { %v491_v19 = vrot.slane %v490_v16, 1 }
 0x2fc   :  { %v492_v20 = vadd.f32 %v491_v19, %v490_v16 }
 0x2fd   :  { %803 = vmatpush.bf16.msrb.mxu2 %v1554_v18 }
 0x2fe   :  { %v493_v22 = vmul.f32 0.125, %v492_v20 }
 0x300   :  { %v494_v23 = vsub.f32 %v483_v10, %v493_v22 }
 0x301   :  { %804 = vmatpush.bf16.msrb.mxu2 %v1553_v21 }
 0x302   :  { %v495_v25 = vmul.f32 %v494_v23, %v494_v23 }
 0x304   :  { %v496_v26 = vrot.slane %v495_v25, 4 }
 0x306   :  { %v497_v28 = vadd.f32 %v496_v26, %v495_v25 }
 0x308   :  { %v498_v29 = vrot.slane %v497_v28, 2 }
 0x30a   :  { %v499_v31 = vadd.f32 %v498_v29, %v497_v28 }
 0x30c   :  { %v500_v33 = vrot.slane %v499_v31, 1 }
 0x30e   :  { %v501_v34 = vadd.f32 %v500_v33, %v499_v31  ;;  %v713_v33 = vld [vmem:[#allocation10 + $0x4] sm:$0x1] }
 0x310   :  { %v502_v35 = vmul.f32 0.125, %v501_v34 }
 0x312   :  { %v504_v36 = vadd.f32 1e-05, %v502_v35 }
 0x314   :  { %1610 = vrsqrt.f32 %v504_v36  ;;  %vm511_vm11 = vweird.f32 %v504_v36 }
 0x31a   :  { %v1611_v40 = vpop.eup %1610 }
 0x31b   :  { %v506_v41 = vmul.f32 %v1611_v40, %v504_v36  ;;  %vm512_vm10 = vweird.f32 %v1611_v40 }
 0x31c   :  { %vm513_vm12 = vmor %vm511_vm11, %vm512_vm10 }
 0x31d   :  { %v507_v43 = vmul.f32 %v1611_v40, %v506_v41 }
 0x31f   :  { %v508_v44 = vmul.f32 0.5, %v507_v43 }
 0x321   :  { %v509_v46 = vsub.f32 1.5, %v508_v44  ;;  %v1567_v44 = vld [vmem:[#allocation8 + $0x1f8] sm:$0xff] }
 0x322   :  { %912 = vmatpush.bf16.msrb.mxu3 %v1567_v44  ;;  %v1568_v44 = vld [vmem:[#allocation8 + $0x200] sm:$0xff] }
 0x323   :  { %v510_v48 = vmul.f32 %v1611_v40, %v509_v46 }
 0x325   :  { %v514_v50 = vsel %vm513_vm12, %v1611_v40, %v510_v48 }
 0x326   :  { %v515_v51 = vmul.f32 %v514_v50, %v503_v47  ;;  %v1566_v47 = vld [vmem:[#allocation8 + $0x1f0] sm:$0xff] }
 0x327   :  { %913 = vmatpush.bf16.msrb.mxu3 %v1566_v47 }
 0x328   :  { %v516_v52 = vperm.slane %v515_v51, 0  ;;  %v1565_v51 = vld [vmem:[#allocation8 + $0x1e8] sm:$0xff] }
 0x32a   :  { %v517_v55 = vmul.f32 %v516_v52, %v494_v23  ;;  %v1552_v23 = vld [vmem:[#allocation8 + $0x180] sm:$0xff] }
 0x32b   :  { %805 = vmatpush.bf16.msrb.mxu2 %v1552_v23  ;;  %914 = vmatpush.bf16.msrb.mxu3 %v1565_v51 }
 0x32c   :  { %v520_v56 = vadd.f32 %v1597_v53, %v517_v55 }
 0x32e   :  { %v521_v57 = vmax.f32 %v520_v56, 0.0 }
 0x32f   :  { %915 = vmatpush.bf16.msrb.mxu3 %v1564_v54 }
 0x330   :  { %v522_v58 = vpack.c.bf16 %v521_v57, %v521_v57  ;;  %v1563_v57 = vld [vmem:[#allocation8 + $0x1d8] sm:$0xff] }
 0x332   :  { %598 = vmatmul.bf16.vlgmr.msrb.gmra.mxu0 %v522_v58 }
 0x333   :  { %916 = vmatpush.bf16.msrb.mxu3 %v1563_v57 }
 0x3af   :  { %v599_v61 = vpop.f32.mrf.mxu0 }
 0x3b0   :  { %v600_v62 = vadd.f32 %v1598_v60, %v599_v61  ;;  %v1562_v60 = vld [vmem:[#allocation8 + $0x1d0] sm:$0xff] }
 0x3b1   :  { %917 = vmatpush.bf16.msrb.mxu3 %v1562_v60 }
 0x3b2   :  { %v618_v63 = vpack.c.bf16 %v600_v62, %v600_v62  ;;  %604 = vst.msk [vmem:[#allocation3] sm:$0xff] %vm603_vm13, %v600_v62 }
 0x3b3   :  { %617 = dma.vmem_to_hbm [thread:$0]  %s613_s9, 128, %s615_s7, [#allocation4] }
 0x3b4   :  { %692 = vmatmul.bf16.vlgmr.msrb.gmra.mxu1 %v618_v63  ;;  %v1561_v63 = vld [vmem:[#allocation8 + $0x1c8] sm:$0xff] }
 0x3b5   :  { %918 = vmatpush.bf16.msrb.mxu3 %v1561_v63 }
 0x3b7   :  { %v601_v0 = vpop.f32.mrf.mxu0 }
 0x431   :  { %v693_v1 = vpop.f32.mrf.mxu1 }
 0x432   :  { %v697_v3 = vrot.slane %v693_v1, 4 }
 0x434   :  { %v698_v4 = vadd.f32 %v697_v3, %v693_v1 }
 0x436   :  { %v699_v6 = vrot.slane %v698_v4, 2 }
 0x438   :  { %v700_v7 = vadd.f32 %v699_v6, %v698_v4 }
 0x439   :  { %v695_v8 = vpop.f32.mrf.mxu1 }
 0x43a   :  { %v701_v10 = vrot.slane %v700_v7, 1 }
 0x43c   :  { %v702_v11 = vadd.f32 %v701_v10, %v700_v7 }
 0x43e   :  { %v703_v13 = vmul.f32 0.125, %v702_v11  ;;  %v827_v11 = vld [vmem:[#allocation10 + $0x5] sm:$0x1] }
 0x440   :  { %v704_v14 = vsub.f32 %v693_v1, %v703_v13  ;;  %v1560_v1 = vld [vmem:[#allocation8 + $0x1c0] sm:$0xff] }
 0x441   :  { %919 = vmatpush.bf16.msrb.mxu3 %v1560_v1 }
 0x442   :  { %v705_v16 = vmul.f32 %v704_v14, %v704_v14 }
 0x444   :  { %v706_v17 = vrot.slane %v705_v16, 4 }
 0x446   :  { %v707_v19 = vadd.f32 %v706_v17, %v705_v16  ;;  %v1600_v16 = vld [vmem:[#allocation10 + $0xd] ss:$0 sm:$0xff] }
 0x448   :  { %v708_v20 = vrot.slane %v707_v19, 2 }
 0x44a   :  { %v709_v22 = vadd.f32 %v708_v20, %v707_v19 }
 0x44c   :  { %v710_v24 = vrot.slane %v709_v22, 1 }
 0x44e   :  { %v711_v25 = vadd.f32 %v710_v24, %v709_v22  ;;  %v1575_v22 = vld [vmem:[#allocation8 + $0x238] sm:$0xff] }
 0x44f   :  { %1026 = vmatpush.bf16.msra.mxu0 %v1575_v22  ;;  %v1576_v22 = vld [vmem:[#allocation8 + $0x240] sm:$0xff] }
 0x450   :  { %v712_v26 = vmul.f32 0.125, %v711_v25  ;;  %v1574_v25 = vld [vmem:[#allocation8 + $0x230] sm:$0xff] }
 0x452   :  { %v714_v27 = vadd.f32 1e-05, %v712_v26 }
 0x453   :  { %1027 = vmatpush.bf16.msra.mxu0 %v1574_v25 }
 0x454   :  { %1612 = vrsqrt.f32 %v714_v27  ;;  %vm721_vm15 = vweird.f32 %v714_v27 }
 0x45a   :  { %v1613_v28 = vpop.eup %1612 }
 0x45b   :  { %v716_v29 = vmul.f32 %v1613_v28, %v714_v27  ;;  %vm722_vm14 = vweird.f32 %v1613_v28 }
 0x45c   :  { %vm723_vm1 = vmor %vm721_vm15, %vm722_vm14 }
 0x45d   :  { %v717_v30 = vmul.f32 %v1613_v28, %v716_v29  ;;  %v1573_v29 = vld [vmem:[#allocation8 + $0x228] sm:$0xff] }
 0x45e   :  { %1028 = vmatpush.bf16.msra.mxu0 %v1573_v29 }
 0x45f   :  { %v718_v31 = vmul.f32 0.5, %v717_v30 }
 0x461   :  { %v719_v32 = vsub.f32 1.5, %v718_v31 }
 0x463   :  { %v720_v34 = vmul.f32 %v1613_v28, %v719_v32  ;;  %v1572_v32 = vld [vmem:[#allocation8 + $0x220] sm:$0xff] }
 0x464   :  { %1029 = vmatpush.bf16.msra.mxu0 %v1572_v32 }
 0x465   :  { %v724_v35 = vsel %vm723_vm1, %v1613_v28, %v720_v34 }
 0x466   :  { %v725_v36 = vmul.f32 %v724_v35, %v713_v33  ;;  %v1571_v35 = vld [vmem:[#allocation8 + $0x218] sm:$0xff] }
 0x468   :  { %v726_v37 = vperm.slane %v725_v36, 0  ;;  %1030 = vmatpush.bf16.msra.mxu0 %v1571_v35 }
 0x46a   :  { %v727_v39 = vmul.f32 %v726_v37, %v704_v14 }
 0x46c   :  { %v730_v40 = vadd.f32 %v1599_v38, %v727_v39  ;;  %v1570_v38 = vld [vmem:[#allocation8 + $0x210] sm:$0xff] }
 0x46d   :  { %1031 = vmatpush.bf16.msra.mxu0 %v1570_v38 }
 0x46e   :  { %v731_v41 = vmax.f32 %v730_v40, 0.0 }
 0x470   :  { %v732_v42 = vpack.c.bf16 %v731_v41, %v731_v41  ;;  %v1569_v41 = vld [vmem:[#allocation8 + $0x208] sm:$0xff] }
 0x471   :  { %1032 = vmatpush.bf16.msra.mxu0 %v1569_v41  ;;  %v1603_v41 = vld [vmem:[#allocation10 + $0x11] ss:$0 sm:$0xff] }
 0x472   :  { %806 = vmatmul.bf16.vlgmr.msrb.gmra.mxu2 %v732_v42 }
 0x475   :  { %1033 = vmatpush.bf16.msra.mxu0 %v1568_v44 }
 0x4f5   :  { %v807_v43 = vpop.f32.mrf.mxu2 }
 0x4f6   :  { %v811_v45 = vrot.slane %v807_v43, 4 }
 0x4f8   :  { %v812_v46 = vadd.f32 %v811_v45, %v807_v43 }
 0x4fa   :  { %v813_v48 = vrot.slane %v812_v46, 2 }
 0x4fc   :  { %v814_v49 = vadd.f32 %v813_v48, %v812_v46 }
 0x4fd   :  { %v809_v50 = vpop.f32.mrf.mxu2 }
 0x4fe   :  { %v815_v52 = vrot.slane %v814_v49, 1 }
 0x500   :  { %v816_v53 = vadd.f32 %v815_v52, %v814_v49 }
 0x502   :  { %v817_v55 = vmul.f32 0.125, %v816_v53  ;;  %v941_v53 = vld [vmem:[#allocation10 + $0x6] sm:$0x1] }
 0x504   :  { %v818_v56 = vsub.f32 %v807_v43, %v817_v55 }
 0x506   :  { %v819_v58 = vmul.f32 %v818_v56, %v818_v56 }
 0x508   :  { %v820_v59 = vrot.slane %v819_v58, 4 }
 0x50a   :  { %v821_v61 = vadd.f32 %v820_v59, %v819_v58  ;;  %v1601_v58 = vld [vmem:[#allocation10 + $0xe] ss:$0 sm:$0xff] }
 0x50c   :  { %v822_v62 = vrot.slane %v821_v61, 2 }
 0x50e   :  { %v823_v0 = vadd.f32 %v822_v62, %v821_v61 }
 0x510   :  { %v824_v2 = vrot.slane %v823_v0, 1 }
 0x512   :  { %v825_v3 = vadd.f32 %v824_v2, %v823_v0  ;;  %v1583_v0 = vld [vmem:[#allocation8 + $0x278] sm:$0xff] }
 0x513   :  { %1142 = vmatpush.bf16.msra.mxu1 %v1583_v0 }
 0x514   :  { %v826_v4 = vmul.f32 0.125, %v825_v3  ;;  %v1582_v3 = vld [vmem:[#allocation8 + $0x270] sm:$0xff] }
 0x516   :  { %v828_v5 = vadd.f32 1e-05, %v826_v4 }
 0x517   :  { %1143 = vmatpush.bf16.msra.mxu1 %v1582_v3 }
 0x518   :  { %1614 = vrsqrt.f32 %v828_v5  ;;  %vm835_vm3 = vweird.f32 %v828_v5 }
 0x51e   :  { %v1615_v6 = vpop.eup %1614 }
 0x51f   :  { %v830_v7 = vmul.f32 %v1615_v6, %v828_v5  ;;  %vm836_vm2 = vweird.f32 %v1615_v6 }
 0x520   :  { %vm837_vm4 = vmor %vm835_vm3, %vm836_vm2 }
 0x521   :  { %v831_v8 = vmul.f32 %v1615_v6, %v830_v7  ;;  %v1581_v7 = vld [vmem:[#allocation8 + $0x268] sm:$0xff] }
 0x522   :  { %1144 = vmatpush.bf16.msra.mxu1 %v1581_v7 }
 0x523   :  { %v832_v9 = vmul.f32 0.5, %v831_v8 }
 0x525   :  { %v833_v10 = vsub.f32 1.5, %v832_v9 }
 0x527   :  { %v834_v12 = vmul.f32 %v1615_v6, %v833_v10  ;;  %v1580_v10 = vld [vmem:[#allocation8 + $0x260] sm:$0xff] }
 0x528   :  { %1145 = vmatpush.bf16.msra.mxu1 %v1580_v10 }
 0x529   :  { %v838_v13 = vsel %vm837_vm4, %v1615_v6, %v834_v12 }
 0x52a   :  { %v839_v14 = vmul.f32 %v838_v13, %v827_v11  ;;  %v1579_v13 = vld [vmem:[#allocation8 + $0x258] sm:$0xff] }
 0x52c   :  { %v840_v15 = vperm.slane %v839_v14, 0  ;;  %1146 = vmatpush.bf16.msra.mxu1 %v1579_v13 }
 0x52e   :  { %v841_v17 = vmul.f32 %v840_v15, %v818_v56 }
 0x530   :  { %v844_v18 = vadd.f32 %v1600_v16, %v841_v17  ;;  %v1578_v16 = vld [vmem:[#allocation8 + $0x250] sm:$0xff] }
 0x531   :  { %1147 = vmatpush.bf16.msra.mxu1 %v1578_v16 }
 0x532   :  { %v845_v19 = vmax.f32 %v844_v18, 0.0 }
 0x534   :  { %v846_v20 = vpack.c.bf16 %v845_v19, %v845_v19  ;;  %v1577_v19 = vld [vmem:[#allocation8 + $0x248] sm:$0xff] }
 0x535   :  { %1148 = vmatpush.bf16.msra.mxu1 %v1577_v19 }
 0x536   :  { %920 = vmatmul.bf16.vlgmr.msrb.gmra.mxu3 %v846_v20 }
 0x539   :  { %1149 = vmatpush.bf16.msra.mxu1 %v1576_v22 }
 0x5b9   :  { %v921_v21 = vpop.f32.mrf.mxu3 }
 0x5ba   :  { %v925_v23 = vrot.slane %v921_v21, 4 }
 0x5bc   :  { %v926_v24 = vadd.f32 %v925_v23, %v921_v21 }
 0x5be   :  { %v927_v26 = vrot.slane %v926_v24, 2 }
 0x5c0   :  { %v928_v27 = vadd.f32 %v927_v26, %v926_v24 }
 0x5c1   :  { %v923_v28 = vpop.f32.mrf.mxu3 }
 0x5c2   :  { %v929_v30 = vrot.slane %v928_v27, 1 }
 0x5c4   :  { %v930_v31 = vadd.f32 %v929_v30, %v928_v27 }
 0x5c6   :  { %v931_v33 = vmul.f32 0.125, %v930_v31  ;;  %v1055_v31 = vld [vmem:[#allocation10 + $0x7] sm:$0x1] }
 0x5c8   :  { %v932_v34 = vsub.f32 %v921_v21, %v931_v33 }
 0x5ca   :  { %v933_v36 = vmul.f32 %v932_v34, %v932_v34 }
 0x5cc   :  { %v934_v37 = vrot.slane %v933_v36, 4 }
 0x5ce   :  { %v935_v39 = vadd.f32 %v934_v37, %v933_v36  ;;  %v1602_v36 = vld [vmem:[#allocation10 + $0xf] ss:$0 sm:$0xff] }
 0x5d0   :  { %v936_v40 = vrot.slane %v935_v39, 2 }
 0x5d2   :  { %v937_v42 = vadd.f32 %v936_v40, %v935_v39 }
 0x5d4   :  { %v938_v43 = vrot.slane %v937_v42, 1 }
 0x5d6   :  { %v939_v45 = vadd.f32 %v938_v43, %v937_v42 }
 0x5d8   :  { %v940_v46 = vmul.f32 0.125, %v939_v45 }
 0x5da   :  { %v942_v47 = vadd.f32 1e-05, %v940_v46 }
 0x5dc   :  { %1616 = vrsqrt.f32 %v942_v47  ;;  %vm949_vm6 = vweird.f32 %v942_v47 }
 0x5e2   :  { %v1617_v48 = vpop.eup %1616 }
 0x5e3   :  { %v944_v49 = vmul.f32 %v1617_v48, %v942_v47  ;;  %vm950_vm5 = vweird.f32 %v1617_v48 }
 0x5e4   :  { %vm951_vm7 = vmor %vm949_vm6, %vm950_vm5 }
 0x5e5   :  { %v945_v50 = vmul.f32 %v1617_v48, %v944_v49 }
 0x5e7   :  { %v946_v51 = vmul.f32 0.5, %v945_v50 }
 0x5e9   :  { %v947_v52 = vsub.f32 1.5, %v946_v51 }
 0x5eb   :  { %v948_v54 = vmul.f32 %v1617_v48, %v947_v52 }
 0x5ed   :  { %v952_v55 = vsel %vm951_vm7, %v1617_v48, %v948_v54 }
 0x5ee   :  { %v953_v56 = vmul.f32 %v952_v55, %v941_v53 }
 0x5f0   :  { %v954_v57 = vperm.slane %v953_v56, 0 }
 0x5f2   :  { %v955_v59 = vmul.f32 %v954_v57, %v932_v34 }
 0x5f4   :  { %v958_v60 = vadd.f32 %v1601_v58, %v955_v59 }
 0x5f6   :  { %v959_v61 = vmax.f32 %v958_v60, 0.0 }
 0x5f8   :  { %v960_v62 = vpack.c.bf16 %v959_v61, %v959_v61 }
 0x5fa   :  { %1034 = vmatmul.bf16.vlgmr.msra.gmra.mxu0 %v960_v62 }
 0x677   :  { %v1035_v63 = vpop.f32.mrf.mxu0 }
 0x678   :  { %v1039_v1 = vrot.slane %v1035_v63, 4 }
 0x67a   :  { %v1040_v2 = vadd.f32 %v1039_v1, %v1035_v63 }
 0x67c   :  { %v1041_v4 = vrot.slane %v1040_v2, 2 }
 0x67e   :  { %v1042_v5 = vadd.f32 %v1041_v4, %v1040_v2 }
 0x67f   :  { %v1037_v6 = vpop.f32.mrf.mxu0 }
 0x680   :  { %v1043_v8 = vrot.slane %v1042_v5, 1 }
 0x682   :  { %v1044_v9 = vadd.f32 %v1043_v8, %v1042_v5 }
 0x684   :  { %v1045_v11 = vmul.f32 0.125, %v1044_v9 }
 0x686   :  { %v1046_v12 = vsub.f32 %v1035_v63, %v1045_v11 }
 0x688   :  { %v1047_v14 = vmul.f32 %v1046_v12, %v1046_v12 }
 0x68a   :  { %v1048_v15 = vrot.slane %v1047_v14, 4 }
 0x68c   :  { %v1049_v17 = vadd.f32 %v1048_v15, %v1047_v14 }
 0x68e   :  { %v1050_v18 = vrot.slane %v1049_v17, 2 }
 0x690   :  { %v1051_v20 = vadd.f32 %v1050_v18, %v1049_v17 }
 0x692   :  { %v1052_v21 = vrot.slane %v1051_v20, 1 }
 0x694   :  { %v1053_v23 = vadd.f32 %v1052_v21, %v1051_v20 }
 0x696   :  { %v1054_v24 = vmul.f32 0.125, %v1053_v23 }
 0x698   :  { %v1056_v25 = vadd.f32 1e-05, %v1054_v24 }
 0x69a   :  { %1618 = vrsqrt.f32 %v1056_v25  ;;  %vm1063_vm9 = vweird.f32 %v1056_v25 }
 0x6a0   :  { %v1619_v26 = vpop.eup %1618 }
 0x6a1   :  { %v1058_v27 = vmul.f32 %v1619_v26, %v1056_v25  ;;  %vm1064_vm8 = vweird.f32 %v1619_v26 }
 0x6a2   :  { %vm1065_vm10 = vmor %vm1063_vm9, %vm1064_vm8 }
 0x6a3   :  { %v1059_v28 = vmul.f32 %v1619_v26, %v1058_v27 }
 0x6a5   :  { %v1060_v29 = vmul.f32 0.5, %v1059_v28 }
 0x6a7   :  { %v1061_v30 = vsub.f32 1.5, %v1060_v29 }
 0x6a9   :  { %v1062_v32 = vmul.f32 %v1619_v26, %v1061_v30 }
 0x6ab   :  { %v1066_v33 = vsel %vm1065_vm10, %v1619_v26, %v1062_v32 }
 0x6ac   :  { %v1067_v34 = vmul.f32 %v1066_v33, %v1055_v31 }
 0x6ae   :  { %v1068_v35 = vperm.slane %v1067_v34, 0 }
 0x6b0   :  { %v1069_v37 = vmul.f32 %v1068_v35, %v1046_v12 }
 0x6b2   :  { %v1072_v38 = vadd.f32 %v1602_v36, %v1069_v37 }
 0x6b4   :  { %v1073_v39 = vmax.f32 %v1072_v38, 0.0 }
 0x6b6   :  { %v1074_v40 = vpack.c.bf16 %v1073_v39, %v1073_v39 }
 0x6b8   :  { %1150 = vmatmul.bf16.vlgmr.msra.gmra.mxu1 %v1074_v40 }
 0x735   :  { %v1151_v42 = vpop.f32.mrf.mxu1 }
 0x736   :  { %v1152_v43 = vadd.f32 %v1603_v41, %v1151_v42 }
 0x738   :  { %1155 = vst.msk [vmem:[#allocation11] sm:$0xff] %vm64_vm0, %v1152_v43 }
 0x73d   :  { %v1153_v44 = vpop.f32.mrf.mxu1 }
 0x73e   :  { %1744 = dma.done.wait [#allocation4], 128 }
 0x73f   :  { %1745 = vsyncadd [#allocation4], 4294967168  ;;  %s1166_s12 = sshll.u32 %s1803_s3, 4  ;;  %s1757_s13 = smov [#allocation11]   ;;  %s1167_s12 = int_to_ptr.hbm [resolvable:$true] %s1166_s12 }
 0x740   :  { %s1164_s14 = sshll.u32 %s1757_s13, 4  ;;  %s1165_s14 = int_to_ptr.vmem [resolvable:$true] %s1164_s14 }
 0x741   :  { %1169 = dma.vmem_to_hbm [thread:$0]  %s1165_s14, 128, %s1167_s12, [#allocation7]  }
 0x742   :  { %1746 = dma.done.wait [#allocation7], 128  }
 0x743   :  { %1747 = vsyncadd [#allocation7], 4294967168 }
 0x744   :  { %1174 = vsyncpa [#allocation6], 1 }
 0x745   :  { %1175 = vsyncpa [#allocation9], 1 }
 0x746   :  { %1176 = vsyncpa [#allocation7], 1 }
 0x747   :  { %1177 = vsyncmov [#allocation4] }
 0x74a   :  { %s1178_s4 = vpop.sfrf %1177 }
 0x74b   :  { %p1503_p0 = scmp.ne.s32.totalorder %s1178_s4, 0 }
 0x74d   :  { %1182 = shalt.err (%p1503_p0)  }

</bundles_post_ra>
